<compile_context>
chip_gen: v6e
topology: v6e:2x2x1
jax: 0.10.0
libtpu: 0.0.40
codegen_flags: <defaults>
</compile_context>

<pallas_src>
import functools
import math

import numpy as np

import jax
import jax.numpy as jnp
from jax import lax
from jax.experimental import pallas as pl
from jax.experimental.pallas import tpu as pltpu

_LANES = 128
_SUBLANES = 8
_MAX_FOLD_LANES = 512                   # widest lane-dense fold (lcm(C, 128))
_FOLD_PRECISION = lax.Precision.HIGH    # 3-pass f32 matmul: keeps the folded
                                        # path HBM-bound on v5e, ~1e-5 accurate.


def _cdiv(a, b):
    return -(-a // b)


@functools.lru_cache(maxsize=1)
def _device_kind():
    try:
        return jax.devices()[0].device_kind.lower()
    except Exception:
        return ""


@functools.lru_cache(maxsize=1)
def _is_v7():
    return "7" in _device_kind()


@functools.lru_cache(maxsize=1)
def _vmem_capacity_bytes():
    try:
        cap = int(pltpu.get_tpu_info().vmem_capacity_bytes)
        if cap > 0:
            return cap
    except Exception:
        pass
    # Generation-aware fallback: v7x = 64 MiB / TensorCore, v4/v5e/v6e = 128 MiB.
    return (64 << 20) if _is_v7() else (128 << 20)


def _target_block_bytes():
    # Multi-MiB blocks amortize the ~0.35us/grid-step overhead (>=85% of HBM
    # roofline).  v7x's smaller 64 MiB VMEM gets ~4 MiB; v5e/v6e get ~8 MiB.
    return (4 << 20) if _vmem_capacity_bytes() <= (64 << 20) else (8 << 20)


def _min_grid_steps():
    # One TensorCore on v5e/v6e -> 2 steps suffice for pipelining;
    # v7x shards "parallel" grid axes across 2 TensorCores -> keep >= 4.
    return 4 if _is_v7() else 2


def _vmem_limit_bytes(block_bytes):
    cap = _vmem_capacity_bytes()
    # in + out, double-buffered, plus params / compiler scratch headroom.
    need = 4 * block_bytes + (8 << 20)
    return int(min(cap * 3 // 4, max(need, 32 << 20)))


def _row_align(itemsize):
    # second-minor tiling: 8 sublanes (4-byte), 16 (2-byte), 32 (1-byte)
    return max(_SUBLANES, 32 // itemsize)


def _pick_row_tile(n_rows, row_bytes, itemsize):
    """Rows per block, sized by bytes (generation-aware target), aligned to the
    sublane tile, and keeping only the minimal grid depth needed for
    pipelining / the v7x dual-core split."""
    align = _row_align(itemsize)
    if n_rows <= align:
        return n_rows                                  # == full dim -> legal
    tile = max(_target_block_bytes() // max(row_bytes, 1), align)
    tile = min(tile, max(_cdiv(n_rows, _min_grid_steps()), align))
    tile = max(align, (tile // align) * align)
    return min(tile, n_rows)


# --------------------------------------------------------------------------
# Kernel bodies (one-pass statistics, f32 accumulation, biased variance)
# --------------------------------------------------------------------------

def _ln_rows_kernel(x_ref, w_ref, b_ref, o_ref, *, eps):
    """LayerNorm over the last axis of a (rows, C) block (lane-dense / ragged C)."""
    x = x_ref[...].astype(jnp.float32)                       # (TR, C)
    mean = jnp.mean(x, axis=-1, keepdims=True)
    meansq = jnp.mean(x * x, axis=-1, keepdims=True)
    var = jnp.maximum(meansq - mean * mean, 0.0)             # biased variance
    inv = lax.rsqrt(var + eps)
    o_ref[...] = ((x - mean) * inv * w_ref[...] + b_ref[...]).astype(o_ref.dtype)


def _ln_rows_folded_kernel(x_ref, w_ref, b_ref, m_ref, o_ref, *, eps):
    """Lane-dense variant for C not a multiple of 128: each physical row packs
    k = L // C logical rows (L = lcm(C, 128)).  The per-segment sum/sum-sq
    reductions (and their broadcast back across the segment) are two
    independent matmuls with a block-diagonal averaging matrix on the
    otherwise idle MXU — no cross-lane relayouts, no masked stores."""
    x = x_ref[...].astype(jnp.float32)                       # (TR, L)
    m = m_ref[...]                                           # (L, L) f32
    mean = jnp.dot(x, m, preferred_element_type=jnp.float32,
                   precision=_FOLD_PRECISION)
    meansq = jnp.dot(x * x, m, preferred_element_type=jnp.float32,
                     precision=_FOLD_PRECISION)
    var = jnp.maximum(meansq - mean * mean, 0.0)
    inv = lax.rsqrt(var + eps)
    o_ref[...] = ((x - mean) * inv * w_ref[...] + b_ref[...]).astype(o_ref.dtype)


def _ln_cfirst_kernel(x_ref, w_ref, b_ref, o_ref, *, eps):
    """channels_first LayerNorm on a (bn, C, hw_tile) block: C on sublanes,
    a tile of H*W on lanes; reduce across the sublane axis (no transposes)."""
    x = x_ref[...].astype(jnp.float32)                       # (bn, C, T)
    mean = jnp.mean(x, axis=1, keepdims=True)                # (bn, 1, T)
    meansq = jnp.mean(x * x, axis=1, keepdims=True)
    var = jnp.maximum(meansq - mean * mean, 0.0)
    inv = lax.rsqrt(var + eps)
    o_ref[...] = ((x - mean) * inv * w_ref[...] + b_ref[...]).astype(o_ref.dtype)


# --------------------------------------------------------------------------
# Wrappers
# --------------------------------------------------------------------------

@functools.partial(jax.jit, static_argnames=("eps",))
def _ln_channels_last_plain(x, weight, bias, eps):
    C = x.shape[-1]
    lead = x.shape[:-1]
    x2d = x.reshape(-1, C)                                   # contiguous -> free
    R = x2d.shape[0]
    itemsize = jnp.dtype(x2d.dtype).itemsize
    tile = _pick_row_tile(R, C * itemsize, itemsize)
    block_bytes = tile * C * itemsize

    wf = weight.astype(jnp.float32).reshape(1, C)
    bf = bias.astype(jnp.float32).reshape(1, C)

    out = pl.pallas_call(
        functools.partial(_ln_rows_kernel, eps=eps),
        out_shape=jax.ShapeDtypeStruct((R, C), x2d.dtype),
        grid_spec=pltpu.PrefetchScalarGridSpec(
            num_scalar_prefetch=0,
            grid=(_cdiv(R, tile),),
            in_specs=[
                pl.BlockSpec((tile, C), lambda i: (i, 0)),
                pl.BlockSpec((1, C), lambda i: (0, 0)),
                pl.BlockSpec((1, C), lambda i: (0, 0)),
            ],
            out_specs=pl.BlockSpec((tile, C), lambda i: (i, 0)),
        ),
        compiler_params=pltpu.CompilerParams(
            dimension_semantics=("parallel",),
            vmem_limit_bytes=_vmem_limit_bytes(block_bytes),
        ),
    )(x2d, wf, bf)
    return out.reshape(*lead, C)


@functools.partial(jax.jit, static_argnames=("eps",))
def _ln_channels_last_folded(x, weight, bias, eps):
    C = x.shape[-1]
    lead = x.shape[:-1]
    L = math.lcm(C, _LANES)
    k = L // C
    R = math.prod(lead) if lead else 1
    Rf = R // k
    xf = x.reshape(Rf, L)                                    # contiguous -> free
    itemsize = jnp.dtype(x.dtype).itemsize
    tile = _pick_row_tile(Rf, L * itemsize, itemsize)
    block_bytes = tile * L * itemsize

    # weight/bias repeated for the k logical rows packed per physical row (f32).
    wf = jnp.tile(weight.astype(jnp.float32), k).reshape(1, L)
    bf = jnp.tile(bias.astype(jnp.float32), k).reshape(1, L)
    # Block-diagonal averaging matrix (compile-time constant):
    # avg[i, j] = 1/C iff i and j are in the same C-wide segment.
    seg = np.arange(L) // C
    avg = jnp.asarray((seg[:, None] == seg[None, :]).astype(np.float32) / float(C))

    out = pl.pallas_call(
        functools.partial(_ln_rows_folded_kernel, eps=eps),
        out_shape=jax.ShapeDtypeStruct((Rf, L), x.dtype),
        grid_spec=pltpu.PrefetchScalarGridSpec(
            num_scalar_prefetch=0,
            grid=(_cdiv(Rf, tile),),
            in_specs=[
                pl.BlockSpec((tile, L), lambda i: (i, 0)),
                pl.BlockSpec((1, L), lambda i: (0, 0)),
                pl.BlockSpec((1, L), lambda i: (0, 0)),
                pl.BlockSpec((L, L), lambda i: (0, 0)),
            ],
            out_specs=pl.BlockSpec((tile, L), lambda i: (i, 0)),
        ),
        compiler_params=pltpu.CompilerParams(
            dimension_semantics=("parallel",),
            vmem_limit_bytes=_vmem_limit_bytes(block_bytes),
        ),
    )(xf, wf, bf, avg)
    return out.reshape(*lead, C)


@functools.partial(jax.jit, static_argnames=("eps",))
def _ln_channels_first(x, weight, bias, eps):
    N, C, H, W = x.shape
    HW = H * W
    x3 = x.reshape(N, C, HW)                                 # contiguous -> free
    itemsize = jnp.dtype(x.dtype).itemsize
    target = _target_block_bytes()
    slab = C * HW * itemsize                                 # one batch element

    if slab <= target:
        col_tile = HW                                        # full dim -> legal
        bn = max(1, min(N, target // slab))
        bn = min(bn, max(1, _cdiv(N, _min_grid_steps())))    # minimal grid depth
    else:
        bn = 1
        col_tile = max(_LANES, (target // (C * itemsize)) // _LANES * _LANES)
        if col_tile >= HW:
            col_tile = HW
    block_bytes = bn * C * col_tile * itemsize

    wf = weight.astype(jnp.float32).reshape(1, C, 1)
    bf = bias.astype(jnp.float32).reshape(1, C, 1)

    out = pl.pallas_call(
        functools.partial(_ln_cfirst_kernel, eps=eps),
        out_shape=jax.ShapeDtypeStruct((N, C, HW), x.dtype),
        grid_spec=pltpu.PrefetchScalarGridSpec(
            num_scalar_prefetch=0,
            grid=(_cdiv(N, bn), _cdiv(HW, col_tile)),
            in_specs=[
                pl.BlockSpec((bn, C, col_tile), lambda n, t: (n, 0, t)),
                pl.BlockSpec((1, C, 1), lambda n, t: (0, 0, 0)),
                pl.BlockSpec((1, C, 1), lambda n, t: (0, 0, 0)),
            ],
            out_specs=pl.BlockSpec((bn, C, col_tile), lambda n, t: (n, 0, t)),
        ),
        compiler_params=pltpu.CompilerParams(
            dimension_semantics=("parallel", "parallel"),
            vmem_limit_bytes=_vmem_limit_bytes(block_bytes),
        ),
    )(x3, wf, bf)
    return out.reshape(N, C, H, W)


def _channels_last_dispatch(x, weight, bias, eps):
    C = x.shape[-1]
    R = math.prod(x.shape[:-1]) if x.ndim > 1 else 1
    if C % _LANES != 0:
        L = math.lcm(C, _LANES)
        k = L // C
        if L <= _MAX_FOLD_LANES and R % k == 0 and R >= k:
            try:
                return _ln_channels_last_folded(x, weight, bias, eps=eps)
            except Exception:
                # Only guards against toolchain lowering gaps (e.g. the 3-pass
                # matmul precision); the plain row kernel below is always correct.
                pass
    return _ln_channels_last_plain(x, weight, bias, eps=eps)


def layer_norm(x, weight, bias, eps=1e-6, data_format="channels_last"):
    """Forward pass of the PyTorch LayerNorm module (both data formats)."""
    if data_format == "channels_last":
        return _channels_last_dispatch(x, weight, bias, eps)
    elif data_format == "channels_first":
        N, C, H, W = x.shape
        if H * W < _LANES:
            # Lane-dense path for small spatial extents (ConvNeXt 7x7 / 14x14
            # stages): one transpose each way beats ~60% masked lanes on every
            # load and store of the dedicated channels_first kernel.
            y = _channels_last_dispatch(
                jnp.transpose(x, (0, 2, 3, 1)), weight, bias, eps)
            return jnp.transpose(y, (0, 3, 1, 2))
        return _ln_channels_first(x, weight, bias, eps=eps)
    else:
        raise NotImplementedError


# --------------------------------------------------------------------------
# Self-test
# --------------------------------------------------------------------------

def _reference(x, weight, bias, eps, data_format):
    x = x.astype(jnp.float32)
    if data_format == "channels_last":
        mean = jnp.mean(x, axis=-1, keepdims=True)
        var = jnp.mean((x - mean) ** 2, axis=-1, keepdims=True)
        return (x - mean) / jnp.sqrt(var + eps) * weight + bias
    else:
        mean = jnp.mean(x, axis=1, keepdims=True)
        var = jnp.mean((x - mean) ** 2, axis=1, keepdims=True)
        xn = (x - mean) / jnp.sqrt(var + eps)
        return weight[None, :, None, None] * xn + bias[None, :, None, None]


if __name__ == "__main__":
    key = jax.random.PRNGKey(0)
    eps = 1e-6
    k1, k2, k3, k4 = jax.random.split(key, 4)

    # 1) channels_last, C=32 (< 128): exercises the lane-dense folded/MXU path.
    C1 = 32
    w1 = jnp.ones((C1,), jnp.float32) + 0.01 * jnp.arange(C1, dtype=jnp.float32)
    b1 = jnp.zeros((C1,), jnp.float32) + 0.1
    x1 = jax.random.normal(k1, (2, 8, 8, C1), jnp.float32)
    y1 = jax.block_until_ready(layer_norm(x1, w1, b1, eps, "channels_last"))
    r1 = _reference(x1, w1, b1, eps, "channels_last")
    assert jnp.max(jnp.abs(y1 - r1)) < 2e-3, "channels_last (folded) mismatch"

    # 2) channels_last, C=160 with a ragged row count (2*5*7=70 rows):
    #    exercises the general row kernel and the masked partial last block.
    C2 = 160
    w2 = jnp.ones((C2,), jnp.float32) - 0.005 * jnp.arange(C2, dtype=jnp.float32)
    b2 = jnp.full((C2,), -0.05, jnp.float32)
    x2 = jax.random.normal(k2, (2, 5, 7, C2), jnp.float32)
    y2 = jax.block_until_ready(layer_norm(x2, w2, b2, eps, "channels_last"))
    r2 = _reference(x2, w2, b2, eps, "channels_last")
    assert jnp.max(jnp.abs(y2 - r2)) < 1e-3, "channels_last (plain) mismatch"

    # 3) channels_first, small spatial (HW=64 < 128): lane-dense transpose path.
    C3 = 32
    w3 = jnp.ones((C3,), jnp.float32) + 0.02 * jnp.arange(C3, dtype=jnp.float32)
    b3 = jnp.zeros((C3,), jnp.float32) + 0.2
    x3 = jax.random.normal(k3, (2, C3, 8, 8), jnp.float32)
    y3 = jax.block_until_ready(layer_norm(x3, w3, b3, eps, "channels_first"))
    r3 = _reference(x3, w3, b3, eps, "channels_first")
    assert jnp.max(jnp.abs(y3 - r3)) < 2e-3, "channels_first (small HW) mismatch"

    # 4) channels_first, HW=256 >= 128: dedicated transpose-free kernel.
    C4 = 32
    w4 = jnp.ones((C4,), jnp.float32) - 0.01 * jnp.arange(C4, dtype=jnp.float32)
    b4 = jnp.full((C4,), 0.03, jnp.float32)
    x4 = jax.random.normal(k4, (2, C4, 16, 16), jnp.float32)
    y4 = jax.block_until_ready(layer_norm(x4, w4, b4, eps, "channels_first"))
    r4 = _reference(x4, w4, b4, eps, "channels_first")
    assert jnp.max(jnp.abs(y4 - r4)) < 1e-3, "channels_first (dedicated) mismatch"

    print("KERNEL_OK")
</pallas_src>

<mosaic_0001>
module attributes {stable_mosaic.version = 11 : i64} {
  func.func @_ln_rows_kernel(%arg0: i32, %arg1: memref<64x32xf32, #tpu.memory_space<vmem>>, %arg2: memref<1x32xf32, #tpu.memory_space<vmem>>, %arg3: memref<1x32xf32, #tpu.memory_space<vmem>>, %arg4: memref<64x32xf32, #tpu.memory_space<vmem>>) attributes {dimension_semantics = [#tpu.dimension_semantics<parallel>], iteration_bounds = array<i64: 2>, scalar_prefetch = 0 : i64, scratch_operands = 0 : i64, tpu.core_type = #tpu.core_type<tc>, window_params = [{transform_indices = @transform_0, window_bounds = array<i64: 64, 32>}, {pipeline_mode = #tpu.pipeline_mode<synchronous>, transform_indices = @transform_1, window_bounds = array<i64: 1, 32>}, {pipeline_mode = #tpu.pipeline_mode<synchronous>, transform_indices = @transform_2, window_bounds = array<i64: 1, 32>}, {transform_indices = @transform_3, window_bounds = array<i64: 64, 32>}]} {
    %c0 = arith.constant 0 : index
    %c0_0 = arith.constant 0 : index
    %0 = vector.load %arg1[%c0, %c0_0] : memref<64x32xf32, #tpu.memory_space<vmem>>, vector<64x32xf32>
    %cst = arith.constant dense<0.000000e+00> : vector<64xf32>
    %1 = vector.multi_reduction <add>, %0, %cst [1] : vector<64x32xf32> to vector<64xf32>
    %2 = vector.shape_cast %1 : vector<64xf32> to vector<64x1xf32>
    %cst_1 = arith.constant 3.200000e+01 : f32
    %3 = vector.broadcast %cst_1 : f32 to vector<64x1xf32>
    %4 = arith.divf %2, %3 : vector<64x1xf32>
    %5 = arith.mulf %0, %0 : vector<64x32xf32>
    %cst_2 = arith.constant dense<0.000000e+00> : vector<64xf32>
    %6 = vector.multi_reduction <add>, %5, %cst_2 [1] : vector<64x32xf32> to vector<64xf32>
    %7 = vector.shape_cast %6 : vector<64xf32> to vector<64x1xf32>
    %cst_3 = arith.constant 3.200000e+01 : f32
    %8 = vector.broadcast %cst_3 : f32 to vector<64x1xf32>
    %9 = arith.divf %7, %8 : vector<64x1xf32>
    %10 = arith.mulf %4, %4 : vector<64x1xf32>
    %11 = arith.subf %9, %10 : vector<64x1xf32>
    %cst_4 = arith.constant 0.000000e+00 : f32
    %12 = vector.broadcast %cst_4 : f32 to vector<64x1xf32>
    %13 = arith.maximumf %11, %12 : vector<64x1xf32>
    %cst_5 = arith.constant 9.99999997E-7 : f32
    %14 = vector.broadcast %cst_5 : f32 to vector<64x1xf32>
    %15 = arith.addf %13, %14 : vector<64x1xf32>
    %16 = math.rsqrt %15 : vector<64x1xf32>
    %17 = vector.broadcast %4 : vector<64x1xf32> to vector<64x32xf32>
    %18 = arith.subf %0, %17 : vector<64x32xf32>
    %19 = vector.broadcast %16 : vector<64x1xf32> to vector<64x32xf32>
    %20 = arith.mulf %18, %19 : vector<64x32xf32>
    %c0_6 = arith.constant 0 : index
    %c0_7 = arith.constant 0 : index
    %21 = vector.load %arg2[%c0_6, %c0_7] : memref<1x32xf32, #tpu.memory_space<vmem>>, vector<1x32xf32>
    %22 = vector.broadcast %21 : vector<1x32xf32> to vector<64x32xf32>
    %23 = arith.mulf %20, %22 : vector<64x32xf32>
    %c0_8 = arith.constant 0 : index
    %c0_9 = arith.constant 0 : index
    %24 = vector.load %arg3[%c0_8, %c0_9] : memref<1x32xf32, #tpu.memory_space<vmem>>, vector<1x32xf32>
    %25 = vector.broadcast %24 : vector<1x32xf32> to vector<64x32xf32>
    %26 = arith.addf %23, %25 : vector<64x32xf32>
    %c0_10 = arith.constant 0 : index
    %c0_11 = arith.constant 0 : index
    %27 = vector.load %arg4[%c0_10, %c0_11] : memref<64x32xf32, #tpu.memory_space<vmem>>, vector<64x32xf32>
    tpu.vector_store %arg4[%c0_10, %c0_11], %26 {strides = array<i32>} : memref<64x32xf32, #tpu.memory_space<vmem>>, vector<64x32xf32>,
    return
  }
  func.func @transform_0(%arg0: i32) -> (i32, i32) {
    %c0_i32 = arith.constant 0 : i32
    %c0_i32_0 = arith.constant 0 : i32
    return %arg0, %c0_i32 : i32, i32
  }
  func.func @transform_1(%arg0: i32) -> (i32, i32) {
    %c0_i32 = arith.constant 0 : i32
    %c0_i32_0 = arith.constant 0 : i32
    %c0_i32_1 = arith.constant 0 : i32
    return %c0_i32, %c0_i32_0 : i32, i32
  }
  func.func @transform_2(%arg0: i32) -> (i32, i32) {
    %c0_i32 = arith.constant 0 : i32
    %c0_i32_0 = arith.constant 0 : i32
    %c0_i32_1 = arith.constant 0 : i32
    return %c0_i32, %c0_i32_0 : i32, i32
  }
  func.func @transform_3(%arg0: i32) -> (i32, i32) {
    %c0_i32 = arith.constant 0 : i32
    %c0_i32_0 = arith.constant 0 : i32
    return %arg0, %c0_i32 : i32, i32
  }
}

</mosaic_0001>

<bundles_post_ra>
// kernel: _ln_channels_last_plain.1
= control target key start
LH: loop header
LB: loop body
LE: loop exit
PB: predicated region body
PF: predicated region fallthrough
CT: control target
= control target key end

     0   :  { %8 = vsyncpa [#allocation3], 0  ;;  %s945_s0 = inlined_call_operand.hbm [shape: f32[128,32], index: 0, kind: input, shape index: {}]   ;;  %s946_s1 = inlined_call_operand.vmem [shape: f32[1,32], index: 1, kind: input, shape index: {}]   ;;  %s947_s2 = inlined_call_operand.vmem [shape: f32[1,32], index: 2, kind: input, shape index: {}]   ;;  %s948_s3 = inlined_call_operand.hbm [shape: f32[128,32], index: 3, kind: output, shape index: {}]  }
   0x1   :  { %10 = vsyncpa [#allocation3 + $0x1], 0 }
   0x2   :  { %11 = vsyncpa [#allocation4], 0 }
   0x3   :  { %13 = vsyncpa [#allocation4 + $0x1], 0  ;;  %s658_s12 = smov 0   ;;  %s660_s13 = smov 0  }
   0x4   :  { %s662_s14 = smov 0   ;;  %s664_s15 = smov 0  }
   0x5 LB: > { %s679_s16 = sadd.s32 4294967295, %s630_s15   ;;  %s454_s17 = sadd.s32 4294967294, %s630_s15   ;;  %s630_s15 = sphi %s664_s15, %s963_s15   ;;  %s626_s14 = sphi %s662_s14, %s962_s14   ;;  %s622_s13 = sphi %s660_s13, %s961_s13   ;;  %s618_s12 = sphi %s658_s12, %s960_s12  }
   0x6   : > { %s683_s18 = sadd.s32 1, %s630_s15   ;;  %s26_s19 = sadd.s32 1, %s626_s14 }
   0x7   : > { %s23_s20 = ssub.s32 %s630_s15, %s683_s18  ;;  %p33_p0 = scmp.ne.s32.totalorder %s626_s14, %s622_s13 }
   0x8   : > { %p24_p1 = scmp.eq.s32.totalorder %s23_s20, 0  ;;  %p34_p2 = scmp.eq.s32.totalorder %s630_s15, 0 }
   0x9   : > { %p39_p3 = scmp.ne.s32.totalorder %s622_s13, %s618_s12  ;;  %p40_p4 = scmp.eq.s32.totalorder %s679_s16, 0 }
   0xa   : > { %s695_s21 = scalar_select %p24_p1, %s626_s14, %s26_s19  }
   0xb   : > { %p697_p5 = por %p34_p2, %p33_p0  ;;  %p701_p6 = por %p40_p4, %p39_p3 }
   0xc   : > { %p105_p7 = scmp.eq.s32.totalorder %s679_s16, 1  ;;  %p111_p8 = scmp.eq.s32.totalorder %s454_s17, 1 }
   0xd   : > { %s952_s23 = scalar_select %p701_p6, 1, 0 }
   0xe   : > { %p484_p10 = scmp.lt.s32.totalorder %s630_s15, 2  ;;  %p708_p11 = por %p105_p7, %p33_p0 }
   0xf   : > { %p712_p12 = por %p111_p8, %p39_p3  ;;  %s137_s26 = sand.u32 1, %s626_s14  }
  0x10   : > { %s953_s24 = scalar_select %p708_p11, 1, 0 }
  0x11   : > { %s954_s25 = scalar_select %p712_p12, 1, 0 }
  0x12   : > { %s470_s27 = sshll.u32 %s630_s15, 10  ;;  %s457_s28 = sshll.u32 %s137_s26, 6 }
  0x13   : > { %s721_s4 = scalar_lea.hbm %s945_s0, %s470_s27  ;;  %s141_s5 = scalar_lea.vmem [#allocation2], %s457_s28 }
  0x14   : > { %s148_s6 = sshll.u32 %s141_s5, 4  ;;  %p725_p13 = pnand %p484_p10, %p697_p5  ;;  %s729_s6 = int_to_ptr.vmem [resolvable:$true] %s148_s6 }
  0x15   : > { %s731_s8 = scalar_lea.sflag [#allocation3], %s137_s26  ;;  %s538_s9 = scalar_lea.hbm %s721_s4, 1024 }
  0x16   : > { %p539_p0 = scmp.ne.s32.totalorder %s721_s4, %s538_s9  ;;  %p540_p1 = pneg %p725_p13 }
  0x17   : > { %s543_s17 = scalar_lea.hbm %s945_s0, 2048  ;;  %p544_p4 = scmp.lt.s32.totalorder %s721_s4, %s945_s0 }
  0x18   : > { %p541_p2 = pnand %p540_p1, %p539_p0  ;;  %p545_p5 = scmp.lt.s32.totalorder %s543_s17, %s538_s9 }
  0x1a   : > { %p542_p3 = pneg %p541_p2  ;;  %p546_p7 = por %p545_p5, %p544_p4 }
  0x1c   : > { %p547_p8 = pnand %p546_p7, %p542_p3 }
  0x1e   : > { %550 = shalt.err (!%p547_p8)
}
  0x1f   : > { %s551_s22 = scalar_lea.vmem %s729_s6, 1024  ;;  %s632_s26 = smov [#allocation2]  }
  0x20   : > { %p552_p10 = scmp.ne.s32.totalorder %s729_s6, %s551_s22  ;;  %s556_s27 = sshll.u32 %s632_s26, 4  ;;  %s557_s27 = int_to_ptr.vmem [resolvable:$false] %s556_s27 }
  0x21   : > { %s558_s28 = scalar_lea.vmem %s557_s27, 2048  ;;  %p559_p2 = scmp.lt.s32.totalorder %s729_s6, %s557_s27 }
  0x22   : > { %p554_p9 = pnand %p552_p10, %p540_p1  ;;  %p560_p12 = scmp.lt.s32.totalorder %s558_s28, %s551_s22 }
  0x24   : > { %p555_p0 = pneg %p554_p9  ;;  %p561_p11 = por %p560_p12, %p559_p2 }
  0x26   : > { %p562_p6 = pnand %p561_p11, %p555_p0 }
  0x28   : > { %565 = shalt.err (!%p562_p6)
}
  0x29   : > { %s633_s29 = smov 128   ;;  %s634_s30 = smov 8  }
  0x2a   : > { %479 = dma.hbm_to_vmem [thread:$0]  (!%p725_p13), %s721_s4, 1024, %s729_s6, %s731_s8, %s633_s29, %s633_s29, %s634_s30  }
  0x2b   : > { %p460_p9 = scmp.ge.s32.totalorder %s630_s15, 1  ;;  %p156_p1 = scmp.lt.s32.totalorder %s630_s15, 3 }
  0x2d   : > { %p157_p3 = pnand %p460_p9, %p156_p1 }
  0x2e   : > { %s755_s5 = sand.u32 (!%p157_p3), 1, %s622_s13   ;;  %p956_p6 = scmp.ne.s32.totalorder (!%p157_p3), %s952_s23, 0 }
  0x2f   : > { %160 = sbr.rel (%p157_p3) target bundleno = 264 (0x108), region = 32  ;;  %s461_s9 = sshll.u32 (!%p157_p3), %s755_s5, 6 }
  0x30   : > { %s163_s10 = scalar_lea.sflag (!%p157_p3), [#allocation3], %s755_s5  ;;  %s166_s11 = scalar_lea.vmem (!%p157_p3), [#allocation2], %s461_s9 }
  0x34   : > { %609 = dma.done.wait (%p956_p6), %s163_s10, 1024  }
  0x35   : > { %611 = vsyncadd (%p956_p6), %s163_s10, 4294966272  ;;  %vm199_vm0 = vcmask 261120   ;;  %v765_v0 = vld [vmem:[%s166_s11 + $0x10] sm:$0xff]  ;;  %v767_v1 = vld [vmem:[%s166_s11] sm:$0xff]  ;;  %s871_s8 = scalar_lea.vmem [#allocation5], %s461_s9  ;;  %s471_s17 = sshll.u32 %s679_s16, 10 }
  0x36   : > { %v769_v2 = vld [vmem:[%s166_s11 + $0x18] sm:$0xff]  ;;  %v206_v3 = vsel %vm199_vm0, %v765_v0, 0.0  ;;  %v200_v4 = vsel %vm199_vm0, %v767_v1, 0.0  ;;  %v775_v5 = vld [vmem:[%s166_s11 + $0x8] sm:$0xff]  ;;  %v783_v9 = vld [vmem:[%s166_s11 + $0x20] sm:$0xff]  ;;  %v233_v17 = vmul.f32 %v767_v1, %v767_v1  ;;  %v235_v21 = vmul.f32 %v765_v0, %v765_v0  ;;  %s381_s19 = sshll.u32 %s871_s8, 4  ;;  %s896_s26 = scalar_lea.hbm %s948_s3, %s471_s17  ;;  %s898_s19 = int_to_ptr.vmem [resolvable:$true] %s381_s19 }
  0x37   : > { %207 = vadd.xlane.f32.xlu1 %v206_v3  ;;  %201 = vadd.xlane.f32.xlu0 %v200_v4  ;;  %v209_v6 = vsel %vm199_vm0, %v769_v2, 0.0  ;;  %v203_v7 = vsel %vm199_vm0, %v775_v5, 0.0  ;;  %v781_v8 = vld [vmem:[%s166_s11 + $0x28] sm:$0xff]  ;;  %v212_v11 = vsel %vm199_vm0, %v783_v9, 0.0  ;;  %v789_v12 = vld [vmem:[%s166_s11 + $0x38] sm:$0xff]  ;;  %v791_v13 = vld [vmem:[%s166_s11 + $0x30] sm:$0xff]  ;;  %v234_v16 = vmul.f32 %v775_v5, %v775_v5 }
  0x38   : > { %v215_v10 = vsel %vm199_vm0, %v781_v8, 0.0  ;;  %v221_v14 = vsel %vm199_vm0, %v789_v12, 0.0  ;;  %v218_v15 = vsel %vm199_vm0, %v791_v13, 0.0  ;;  %v241_v19 = vsel %vm199_vm0, %v233_v17, 0.0  ;;  %s368_s16 = scalar_lea.sflag [#allocation4], %s755_s5  ;;  %s566_s27 = scalar_lea.vmem %s898_s19, 1024 }
  0x39   : > { %v244_v18 = vsel %vm199_vm0, %v234_v16, 0.0  ;;  %v236_v20 = vmul.f32 %v769_v2, %v769_v2  ;;  %v247_v23 = vsel %vm199_vm0, %v235_v21, 0.0  ;;  %v238_v24 = vmul.f32 %v781_v8, %v781_v8  ;;  %p567_p11 = scmp.ne.s32.totalorder %s898_s19, %s566_s27  ;;  %p957_p12 = scmp.ne.s32.totalorder %s953_s24, 0 }
  0x3a   : > { %v237_v25 = vmul.f32 %v783_v9, %v783_v9  ;;  %v240_v28 = vmul.f32 %v789_v12, %v789_v12  ;;  %v239_v29 = vmul.f32 %v791_v13, %v791_v13  ;;  %s635_s28 = smov [#allocation5]  }
  0x3b   : > { %210 = vadd.xlane.f32.xlu1 %v209_v6  ;;  %204 = vadd.xlane.f32.xlu0 %v203_v7  ;;  %v250_v22 = vsel %vm199_vm0, %v236_v20, 0.0  ;;  %v256_v26 = vsel %vm199_vm0, %v238_v24, 0.0  ;;  %p568_p13 = pnand %p567_p11, %p957_p12  ;;  %s570_s29 = sshll.u32 %s635_s28, 4  ;;  %s571_s29 = int_to_ptr.vmem [resolvable:$false] %s570_s29 }
  0x3c   : > { %v253_v27 = vsel %vm199_vm0, %v237_v25, 0.0  ;;  %v262_v30 = vsel %vm199_vm0, %v240_v28, 0.0  ;;  %v259_v31 = vsel %vm199_vm0, %v239_v29, 0.0  ;;  %s572_s30 = scalar_lea.vmem %s571_s29, 2048  ;;  %p573_p5 = scmp.lt.s32.totalorder %s898_s19, %s571_s29 }
  0x3d   : > { %p569_p4 = pneg %p568_p13  ;;  %p574_p7 = scmp.lt.s32.totalorder %s572_s30, %s566_s27 }
  0x3f   : > { %216 = vadd.xlane.f32.xlu1 %v215_v10  ;;  %213 = vadd.xlane.f32.xlu0 %v212_v11  ;;  %p575_p8 = por %p574_p7, %p573_p5 }
  0x41   : > { %p576_p10 = pnand %p575_p8, %p569_p4 }
  0x43   : > { %222 = vadd.xlane.f32.xlu1 %v221_v14  ;;  %219 = vadd.xlane.f32.xlu0 %v218_v15 }
  0x47   : > { %245 = vadd.xlane.f32.xlu1 %v244_v18  ;;  %242 = vadd.xlane.f32.xlu0 %v241_v19 }
  0x4b   : > { %251 = vadd.xlane.f32.xlu1 %v250_v22  ;;  %248 = vadd.xlane.f32.xlu0 %v247_v23 }
  0x4f   : > { %257 = vadd.xlane.f32.xlu1 %v256_v26  ;;  %254 = vadd.xlane.f32.xlu0 %v253_v27 }
  0x53   : > { %263 = vadd.xlane.f32.xlu1 %v262_v30  ;;  %260 = vadd.xlane.f32.xlu0 %v259_v31 }
  0xc0   : > { %v208_v32 = vpop.xlane.xlu1 %207  ;;  %v202_v33 = vpop.xlane.xlu0 %201 }
  0xc1   : > { %v821_v40 = vmul.f32 0.03125, %v202_v33  ;;  %v825_v42 = vmul.f32 0.03125, %v208_v32 }
  0xc3   : > { %v273_v46 = vmul.f32 %v821_v40, %v821_v40  ;;  %v275_v52 = vmul.f32 %v825_v42, %v825_v42 }
  0xc4   : > { %v211_v34 = vpop.xlane.xlu1 %210  ;;  %v205_v35 = vpop.xlane.xlu0 %204 }
  0xc5   : > { %v823_v41 = vmul.f32 0.03125, %v205_v35  ;;  %v827_v43 = vmul.f32 0.03125, %v211_v34 }
  0xc7   : > { %v274_v47 = vmul.f32 %v823_v41, %v823_v41  ;;  %v276_v53 = vmul.f32 %v827_v43, %v827_v43 }
  0xc8   : > { %v217_v36 = vpop.xlane.xlu1 %216  ;;  %v214_v37 = vpop.xlane.xlu0 %213 }
  0xc9   : > { %v837_v54 = vmul.f32 0.03125, %v217_v36  ;;  %v839_v61 = vmul.f32 0.03125, %v214_v37 }
  0xcb   : > { %v278_v6 = vmul.f32 %v837_v54, %v837_v54  ;;  %v277_v18 = vmul.f32 %v839_v61, %v839_v61 }
  0xcc   : > { %v223_v38 = vpop.xlane.xlu1 %222  ;;  %v220_v39 = vpop.xlane.xlu0 %219 }
  0xcd   : > { %v843_v7 = vmul.f32 0.03125, %v223_v38  ;;  %v845_v10 = vmul.f32 0.03125, %v220_v39 }
  0xcf   : > { %v280_v23 = vmul.f32 %v843_v7, %v843_v7  ;;  %v279_v24 = vmul.f32 %v845_v10, %v845_v10 }
  0xd0   : > { %v246_v44 = vpop.xlane.xlu1 %245  ;;  %v243_v45 = vpop.xlane.xlu0 %242 }
  0xd1   : > { %v266_v48 = vmul.f32 0.03125, %v246_v44  ;;  %v265_v49 = vmul.f32 0.03125, %v243_v45  ;;  %v314_v44 = vsub.f32 %v775_v5, %v823_v41  ;;  %v316_v5 = vsub.f32 %v769_v2, %v827_v43 }
  0xd3   : > { %v282_v50 = vsub.f32 %v266_v48, %v274_v47  ;;  %v281_v51 = vsub.f32 %v265_v49, %v273_v46  ;;  %v313_v46 = vsub.f32 %v767_v1, %v821_v40  ;;  %v463_v47 = vld [vmem:[%s946_s1] ss:$0 sm:$0xff]  ;;  %v315_v1 = vsub.f32 %v765_v0, %v825_v42 }
  0xd4   : > { %v252_v55 = vpop.xlane.xlu1 %251  ;;  %v249_v56 = vpop.xlane.xlu0 %248  ;;  %v317_v42 = vsub.f32 %v783_v9, %v839_v61  ;;  %v319_v9 = vsub.f32 %v791_v13, %v845_v10 }
  0xd5   : > { %v290_v57 = vmax.f32 %v282_v50, 0.0  ;;  %v289_v58 = vmax.f32 %v281_v51, 0.0  ;;  %v268_v59 = vmul.f32 0.03125, %v252_v55  ;;  %v267_v60 = vmul.f32 0.03125, %v249_v56  ;;  %v464_v50 = vld [vmem:[%s947_s2] ss:$0 sm:$0xff] }
  0xd7   : > { %v298_v62 = vadd.f32 1e-06, %v290_v57  ;;  %v297_v63 = vadd.f32 1e-06, %v289_v58  ;;  %v284_v3 = vsub.f32 %v268_v59, %v276_v53  ;;  %v283_v4 = vsub.f32 %v267_v60, %v275_v52 }
  0xd8   : > { %v258_v11 = vpop.xlane.xlu1 %257  ;;  %v255_v14 = vpop.xlane.xlu0 %254  ;;  %v318_v59 = vsub.f32 %v781_v8, %v837_v54 }
  0xd9   : > { %522 = vrsqrt.f32 %v298_v62  ;;  %v292_v15 = vmax.f32 %v284_v3, 0.0  ;;  %v291_v16 = vmax.f32 %v283_v4, 0.0  ;;  %v270_v17 = vmul.f32 0.03125, %v258_v11 }
  0xda   : > { %524 = vrsqrt.f32 %v297_v63  ;;  %v269_v19 = vmul.f32 0.03125, %v255_v14  ;;  %v320_v3 = vsub.f32 %v789_v12, %v843_v7 }
  0xdb   : > { %v300_v20 = vadd.f32 1e-06, %v292_v15  ;;  %v299_v21 = vadd.f32 1e-06, %v291_v16  ;;  %v286_v22 = vsub.f32 %v270_v17, %v278_v6 }
  0xdc   : > { %v285_v25 = vsub.f32 %v269_v19, %v277_v18  ;;  %v264_v26 = vpop.xlane.xlu1 %263  ;;  %v261_v27 = vpop.xlane.xlu0 %260 }
  0xdd   : > { %526 = vrsqrt.f32 %v300_v20  ;;  %v294_v28 = vmax.f32 %v286_v22, 0.0  ;;  %v272_v29 = vmul.f32 0.03125, %v264_v26  ;;  %v271_v30 = vmul.f32 0.03125, %v261_v27 }
  0xde   : > { %528 = vrsqrt.f32 %v299_v21  ;;  %v293_v31 = vmax.f32 %v285_v25, 0.0 }
  0xdf   : > { %v302_v32 = vadd.f32 1e-06, %v294_v28  ;;  %v288_v33 = vsub.f32 %v272_v29, %v280_v23  ;;  %v287_v34 = vsub.f32 %v271_v30, %v279_v24 }
  0xe0   : > { %v301_v35 = vadd.f32 1e-06, %v293_v31 }
  0xe1   : > { %530 = vrsqrt.f32 %v302_v32  ;;  %v296_v36 = vmax.f32 %v288_v33, 0.0  ;;  %v295_v37 = vmax.f32 %v287_v34, 0.0 }
  0xe2   : > { %532 = vrsqrt.f32 %v301_v35 }
  0xe3   : > { %v304_v38 = vadd.f32 1e-06, %v296_v36  ;;  %v303_v39 = vadd.f32 1e-06, %v295_v37 }
  0xe5   : > { %534 = vrsqrt.f32 %v304_v38 }
  0xe6   : > { %v523_v45 = vpop.eup %522  ;;  %536 = vrsqrt.f32 %v303_v39 }
  0xe7   : > { %v525_v48 = vpop.eup %524  ;;  %v322_v49 = vmul.f32 %v523_v45, %v314_v44 }
  0xe8   : > { %v321_v51 = vmul.f32 %v525_v48, %v313_v46 }
  0xe9   : > { %v337_v41 = vmul.f32 %v463_v47, %v322_v49 }
  0xea   : > { %v527_v52 = vpop.eup %526  ;;  %v336_v40 = vmul.f32 %v463_v47, %v321_v51 }
  0xeb   : > { %v529_v53 = vpop.eup %528  ;;  %v352_v55 = vadd.f32 %v464_v50, %v337_v41  ;;  %v324_v56 = vmul.f32 %v527_v52, %v316_v5 }
  0xec   : > { %v351_v57 = vadd.f32 %v464_v50, %v336_v40  ;;  %v323_v58 = vmul.f32 %v529_v53, %v315_v1 }
  0xed   : > { %360 = vst.msk [vmem:[%s871_s8 + $0x8] sm:$0xff] %vm199_vm0, %v352_v55  ;;  %v339_v2 = vmul.f32 %v463_v47, %v324_v56 }
  0xee   : > { %v531_v0 = vpop.eup %530  ;;  %359 = vst.msk [vmem:[%s871_s8] sm:$0xff] %vm199_vm0, %v351_v57  ;;  %v338_v43 = vmul.f32 %v463_v47, %v323_v58 }
  0xef   : > { %v533_v60 = vpop.eup %532  ;;  %v354_v62 = vadd.f32 %v464_v50, %v339_v2  ;;  %v326_v8 = vmul.f32 %v531_v0, %v318_v59 }
  0xf0   : > { %v353_v54 = vadd.f32 %v464_v50, %v338_v43  ;;  %v325_v63 = vmul.f32 %v533_v60, %v317_v42 }
  0xf1   : > { %362 = vst.msk [vmem:[%s871_s8 + $0x18] sm:$0xff] %vm199_vm0, %v354_v62  ;;  %v341_v4 = vmul.f32 %v463_v47, %v326_v8 }
  0xf2   : > { %v535_v6 = vpop.eup %534  ;;  %361 = vst.msk [vmem:[%s871_s8 + $0x10] sm:$0xff] %vm199_vm0, %v353_v54  ;;  %v340_v61 = vmul.f32 %v463_v47, %v325_v63 }
  0xf3   : > { %v537_v11 = vpop.eup %536  ;;  %v356_v14 = vadd.f32 %v464_v50, %v341_v4  ;;  %v328_v15 = vmul.f32 %v535_v6, %v320_v3 }
  0xf4   : > { %v355_v16 = vadd.f32 %v464_v50, %v340_v61  ;;  %v327_v17 = vmul.f32 %v537_v11, %v319_v9 }
  0xf5   : > { %364 = vst.msk [vmem:[%s871_s8 + $0x28] sm:$0xff] %vm199_vm0, %v356_v14  ;;  %v343_v12 = vmul.f32 %v463_v47, %v328_v15 }
  0xf6   : > { %363 = vst.msk [vmem:[%s871_s8 + $0x20] sm:$0xff] %vm199_vm0, %v355_v16  ;;  %v342_v13 = vmul.f32 %v463_v47, %v327_v17 }
  0xf7   : > { %v358_v7 = vadd.f32 %v464_v50, %v343_v12 }
  0xf8   : > { %v357_v10 = vadd.f32 %v464_v50, %v342_v13 }
  0xf9   : > { %366 = vst.msk [vmem:[%s871_s8 + $0x38] sm:$0xff] %vm199_vm0, %v358_v7 }
  0xfa   : > { %365 = vst.msk [vmem:[%s871_s8 + $0x30] sm:$0xff] %vm199_vm0, %v357_v10 }
  0xfb   : > { %579 = shalt.err (!%p576_p10)
}
  0xfc   : > { %s580_s9 = scalar_lea.hbm %s896_s26, 1024  ;;  %s584_s23 = scalar_lea.hbm %s948_s3, 2048 }
  0xfd   : > { %p581_p0 = scmp.ne.s32.totalorder %s896_s26, %s580_s9  ;;  %p585_p1 = scmp.lt.s32.totalorder %s896_s26, %s948_s3 }
  0xfe   : > { %p586_p3 = scmp.lt.s32.totalorder %s584_s23, %s580_s9 }
  0xff   : > { %p582_p2 = pnand %p581_p0, %p957_p12 }
 0x100   : > { %p587_p6 = por %p586_p3, %p585_p1 }
 0x101   : > { %p583_p9 = pneg %p582_p2 }
 0x103   : > { %p588_p11 = pnand %p587_p6, %p583_p9 }
 0x105   : > { %591 = shalt.err (!%p588_p11)
}
 0x106   : > { %s636_s7 = smov 128   ;;  %s637_s8 = smov 8  }
 0x107   : > { %474 = dma.vmem_to_hbm [thread:$0]  (%p957_p12), %s898_s19, 1024, %s896_s26, %s368_s16, %s636_s7, %s636_s7, %s637_s8  }
 0x108 PF: > { %s396_s17 = sand.u32 1, %s618_s12   ;;  %p958_p13 = scmp.ne.s32.totalorder %s954_s25, 0 }
 0x109   : > { %p959_p4 = scmp.ge.s32.totalorder %s630_s15, 2  ;;  %s397_s20 = scalar_lea.sflag [#allocation4], %s396_s17 }
 0x10b   : > { %p481_p5 = pnand %p959_p4, %p958_p13 }
 0x10d   : > { %p482_p7 = pneg %p481_p5 }
 0x10f   : > { %613 = dma.done.wait (%p482_p7), %s397_s20, 1024  }
 0x110   : > { %615 = vsyncadd (%p482_p7), %s397_s20, 4294966272  ;;  %p16_p8 = scmp.ge.s32.totalorder %s683_s18, 4   ;;  %s960_s12 = smov %s622_s13 }
 0x111   : > { %s961_s13 = smov %s626_s14  ;;  %s962_s14 = smov %s695_s21 }
 0x112   : > { %s963_s15 = smov %s683_s18  ;;  %18 = sbr.rel (!%p16_p8) target bundleno = 5 (0x5), region = 77 }
 0x117   :  { %402 = vsyncpa [#allocation3], 1 }
 0x118   :  { %404 = vsyncpa [#allocation3 + $0x1], 1 }
 0x119   :  { %405 = vsyncpa [#allocation4], 1 }
 0x11a   :  { %407 = vsyncpa [#allocation4 + $0x1], 1 }

</bundles_post_ra>
